<compile_context>
chip_gen: v6e
topology: v6e:2x2x1
jax: 0.10.0
libtpu: 0.0.40
codegen_flags: <defaults>
</compile_context>

<pallas_src>
from functools import partial

import numpy as np
import jax
import jax.numpy as jnp
from jax.experimental import pallas as pl
from jax.experimental.pallas import tpu as pltpu

_LANES = 128
_MAX_TILE_ROWS = 2048  # 1 MiB per f32 block; fine on v5e / v6e / v7x.


def _clip_kernel(width, height):
    """Build the kernel body with the image bounds baked in as constants."""
    w_max = float(width - 1)
    h_max = float(height - 1)

    def kernel(x_ref, o_ref):
        x = x_ref[...]
        dt = x.dtype
        # Per-lane coordinate id (0:x1, 1:y1, 2:x2, 3:y2).  128 % 4 == 0 so
        # one (1, 128) row suffices; bounds broadcast over sublanes for free.
        coord = jax.lax.broadcasted_iota(jnp.int32, (1, x.shape[1]), 1) & 3
        zero = jnp.asarray(0.0, dtype=dt)
        ninf = jnp.asarray(-jnp.inf, dtype=dt)
        pinf = jnp.asarray(jnp.inf, dtype=dt)
        lo = jnp.where(coord < 2, zero, ninf)                      # x1, y1 >= 0
        hi = jnp.where(coord == 2, jnp.asarray(w_max, dtype=dt),   # x2 <= W-1
                       jnp.where(coord == 3, jnp.asarray(h_max, dtype=dt),
                                 pinf))                            # y2 <= H-1
        o_ref[...] = jnp.minimum(jnp.maximum(x, lo), hi)

    return kernel


def _pick_tile_rows(rows, sub):
    """Largest tile_rows that divides `rows`, is a multiple of `sub`, is
    <= _MAX_TILE_ROWS, and (when possible) leaves >= 2 grid steps so v7x's
    two TensorCores both get work on the 'parallel' axis."""
    units = rows // sub
    limit = _MAX_TILE_ROWS // sub
    if units >= 2:
        limit = min(limit, units // 2)   # guarantee >= 2 grid steps
    limit = max(1, limit)
    best = 1
    for d in range(1, limit + 1):
        if units % d == 0:
            best = d
    return best * sub


@partial(jax.jit, static_argnums=(1, 2))
def _clip_boxes(boxes, height, width):
    B, N, four = boxes.shape
    assert four == 4, "boxes must be (..., 4)"
    dtype = boxes.dtype
    itemsize = jnp.dtype(dtype).itemsize
    sub = max(8, 32 // itemsize)      # sublane packing: f32->8, bf16->16, int8->32
    total = B * N * 4
    block_elems = sub * _LANES

    if total % block_elems == 0:
        # Fast path: pure reshape — no pad copy, no trailing slice copy.
        rows = total // _LANES
        slab = boxes.reshape(rows, _LANES)
        padded = False
    else:
        # Pad only to the minimal sub*128-element multiple.
        padded_total = pl.cdiv(total, block_elems) * block_elems
        flat = jnp.pad(boxes.reshape(-1), (0, padded_total - total))
        rows = padded_total // _LANES
        slab = flat.reshape(rows, _LANES)
        padded = True

    tile_rows = _pick_tile_rows(rows, sub)

    out = pl.pallas_call(
        _clip_kernel(width, height),
        out_shape=jax.ShapeDtypeStruct((rows, _LANES), dtype),
        grid=(rows // tile_rows,),
        in_specs=[pl.BlockSpec((tile_rows, _LANES), lambda i: (i, 0))],
        out_specs=pl.BlockSpec((tile_rows, _LANES), lambda i: (i, 0)),
        compiler_params=pltpu.CompilerParams(
            dimension_semantics=("parallel",)),
        cost_estimate=pl.CostEstimate(
            flops=2 * rows * _LANES,            # one max + one min per element
            transcendentals=0,
            bytes_accessed=2 * rows * _LANES * itemsize),
    )(slab)

    if padded:
        return out.reshape(-1)[:total].reshape(B, N, 4)
    return out.reshape(B, N, 4)


def clip_boxes_forward(boxes, img):
    """JAX/Pallas equivalent of ClipBoxes.forward(boxes, img).

    Only img.shape (H, W) is used; the image tensor itself is never shipped
    into the kernel/jit.  Returns a new clamped (B, N, 4) array.
    """
    # TODO(synk): PyTorch mutates `boxes` in place; JAX is functional, so a new
    # clamped array is returned (in-place aliasing without buffer donation
    # would force an extra XLA copy, so it is intentionally omitted).
    height, width = int(img.shape[2]), int(img.shape[3])
    return _clip_boxes(boxes, height, width)


def _numpy_reference(boxes, img):
    boxes = np.array(boxes, copy=True)
    height, width = img.shape[2], img.shape[3]
    boxes[:, :, 0] = np.clip(boxes[:, :, 0], 0, None)
    boxes[:, :, 1] = np.clip(boxes[:, :, 1], 0, None)
    boxes[:, :, 2] = np.clip(boxes[:, :, 2], None, width - 1)
    boxes[:, :, 3] = np.clip(boxes[:, :, 3], None, height - 1)
    return boxes


if __name__ == "__main__":
    key = jax.random.PRNGKey(0)
    k_boxes, k_img, k_boxes2 = jax.random.split(key, 3)

    # Case 1: fast (no-pad) path — total = 2*128*4 = 1024 = 8*128 elements.
    B, N = 2, 128
    C, H, W = 4, 16, 16
    # Spread coords well beyond [0, W-1] so every clamp actually fires.
    boxes = jax.random.normal(k_boxes, (B, N, 4), dtype=jnp.float32) * 20.0
    img = jax.random.normal(k_img, (B, C, H, W), dtype=jnp.float32)

    out = jax.block_until_ready(clip_boxes_forward(boxes, img))
    ref = _numpy_reference(np.asarray(boxes), np.asarray(img))
    assert out.shape == ref.shape, (out.shape, ref.shape)
    np.testing.assert_allclose(np.asarray(out), ref, rtol=1e-6, atol=1e-6)

    # Case 2: padded path — total = 2*100*4 = 800 (not a multiple of 1024).
    B2, N2 = 2, 100
    boxes2 = jax.random.normal(k_boxes2, (B2, N2, 4), dtype=jnp.float32) * 20.0
    out2 = jax.block_until_ready(clip_boxes_forward(boxes2, img))
    ref2 = _numpy_reference(np.asarray(boxes2), np.asarray(img))
    assert out2.shape == ref2.shape, (out2.shape, ref2.shape)
    np.testing.assert_allclose(np.asarray(out2), ref2, rtol=1e-6, atol=1e-6)

    print("KERNEL_OK")
</pallas_src>

<mosaic_0001>
module attributes {stable_mosaic.version = 11 : i64} {
  func.func @kernel(%arg0: i32, %arg1: memref<8x128xf32, #tpu.memory_space<vmem>>, %arg2: memref<8x128xf32, #tpu.memory_space<vmem>>) attributes {dimension_semantics = [#tpu.dimension_semantics<parallel>], iteration_bounds = array<i64: 1>, scalar_prefetch = 0 : i64, scratch_operands = 0 : i64, tpu.core_type = #tpu.core_type<tc>, window_params = [{transform_indices = @transform_0, window_bounds = array<i64: 8, 128>}, {transform_indices = @transform_1, window_bounds = array<i64: 8, 128>}]} {
    %c0 = arith.constant 0 : index
    %c0_0 = arith.constant 0 : index
    %0 = vector.load %arg1[%c0, %c0_0] : memref<8x128xf32, #tpu.memory_space<vmem>>, vector<8x128xf32>
    %1 = tpu.iota {dimensions = array<i32: 1>} : vector<1x128xi32>
    %c3_i32 = arith.constant 3 : i32
    %2 = vector.broadcast %c3_i32 : i32 to vector<1x128xi32>
    %3 = arith.andi %1, %2 : vector<1x128xi32>
    %c2_i32 = arith.constant 2 : i32
    %4 = vector.broadcast %c2_i32 : i32 to vector<1x128xi32>
    %5 = arith.cmpi slt, %3, %4 : vector<1x128xi32>
    %cst = arith.constant 0.000000e+00 : f32
    %cst_1 = arith.constant 0xFF800000 : f32
    %6 = vector.broadcast %cst : f32 to vector<1x128xf32>
    %7 = vector.broadcast %cst_1 : f32 to vector<1x128xf32>
    %8 = arith.select %5, %6, %7 : vector<1x128xi1>, vector<1x128xf32>
    %c2_i32_2 = arith.constant 2 : i32
    %9 = vector.broadcast %c2_i32_2 : i32 to vector<1x128xi32>
    %10 = arith.cmpi eq, %3, %9 : vector<1x128xi32>
    %c3_i32_3 = arith.constant 3 : i32
    %11 = vector.broadcast %c3_i32_3 : i32 to vector<1x128xi32>
    %12 = arith.cmpi eq, %3, %11 : vector<1x128xi32>
    %cst_4 = arith.constant 1.500000e+01 : f32
    %cst_5 = arith.constant 0x7F800000 : f32
    %13 = vector.broadcast %cst_4 : f32 to vector<1x128xf32>
    %14 = vector.broadcast %cst_5 : f32 to vector<1x128xf32>
    %15 = arith.select %12, %13, %14 : vector<1x128xi1>, vector<1x128xf32>
    %cst_6 = arith.constant 1.500000e+01 : f32
    %16 = vector.broadcast %cst_6 : f32 to vector<1x128xf32>
    %17 = arith.select %10, %16, %15 : vector<1x128xi1>, vector<1x128xf32>
    %18 = vector.broadcast %8 : vector<1x128xf32> to vector<8x128xf32>
    %19 = arith.maximumf %0, %18 : vector<8x128xf32>
    %20 = vector.broadcast %17 : vector<1x128xf32> to vector<8x128xf32>
    %21 = arith.minimumf %19, %20 : vector<8x128xf32>
    %c0_7 = arith.constant 0 : index
    %c0_8 = arith.constant 0 : index
    %22 = vector.load %arg2[%c0_7, %c0_8] : memref<8x128xf32, #tpu.memory_space<vmem>>, vector<8x128xf32>
    tpu.vector_store %arg2[%c0_7, %c0_8], %21 {strides = array<i32>} : memref<8x128xf32, #tpu.memory_space<vmem>>, vector<8x128xf32>,
    return
  }
  func.func @transform_0(%arg0: i32) -> (i32, i32) {
    %c0_i32 = arith.constant 0 : i32
    %c0_i32_0 = arith.constant 0 : i32
    return %arg0, %c0_i32 : i32, i32
  }
  func.func @transform_1(%arg0: i32) -> (i32, i32) {
    %c0_i32 = arith.constant 0 : i32
    %c0_i32_0 = arith.constant 0 : i32
    return %arg0, %c0_i32 : i32, i32
  }
}

</mosaic_0001>

<bundles_post_ra>
// kernel: _clip_boxes.1
= control target key start
LH: loop header
LB: loop body
LE: loop exit
PB: predicated region body
PF: predicated region fallthrough
CT: control target
= control target key end

     0   :  { %v9_v0 = vlaneseq  ;;  %v27_v4 = vmov -inf   ;;  %v28_v6 = vmov inf   ;;  %s45_s0 = inlined_call_operand.vmem [shape: f32[8,128], index: 0, kind: input, shape index: {}]   ;;  %s46_s1 = inlined_call_operand.vmem [shape: f32[8,128], index: 1, kind: output, shape index: {}]  }
   0x1   :  { %v8_v3 = vld [vmem:[%s45_s0] sm:$0xff] }
   0x2   :  { %v10_v1 = vand.u32 127, %v9_v0 }
   0x4   :  { %v11_v2 = vand.u32 3, %v10_v1 }
   0x6   :  { %vm12_vm0 = vcmp.lt.s32.totalorder %v11_v2, 2  ;;  %vm14_vm1 = vcmp.eq.s32.totalorder %v11_v2, 2  ;;  %vm15_vm2 = vcmp.eq.s32.totalorder %v11_v2, 3 }
   0x7   :  { %v13_v5 = vsel %vm12_vm0, 0.0, %v27_v4  ;;  %v16_v7 = vsel %vm15_vm2, 15.0, %v28_v6 }
   0x8   :  { %v17_v8 = vsel %vm14_vm1, 15.0, %v16_v7  ;;  %v18_v9 = vmax.f32 %v8_v3, %v13_v5 }
   0xa   :  { %v19_v10 = vmin.f32 %v18_v9, %v17_v8 }
   0xc   :  { %20 = vst [vmem:[%s46_s1] sm:$0xff] %v19_v10 }

</bundles_post_ra>
